<compile_context>
chip_gen: v7x
topology: tpu7x:2x2x1
jax: 0.10.0
libtpu: 0.0.40
codegen_flags: <defaults>
</compile_context>

<pallas_src>
import jax
import jax.numpy as jnp
from jax import lax
from jax.experimental import pallas as pl
from jax.experimental.pallas import tpu as pltpu


# --------------------------------------------------------------------------
# Kernel
# --------------------------------------------------------------------------
def bottleneck_kernel(x_ref, sdn_ref, sup_ref,
                      w1_ref, s1_ref, b1_ref,
                      wb_ref, s2_ref, b2_ref,
                      w3_ref, s3_ref, b3_ref, out_ref):
    """All refs are lane-dense 2-D slabs (batch folded into rows):
         x_ref   : (RB, W*Cin)        RB = images_per_block * H
         sdn_ref : (RB, RB)           row-shift (h-1), image boundaries zeroed
         sup_ref : (RB, RB)           row-shift (h+1), image boundaries zeroed
         w1_ref  : (W*Cin, W*P)       block-diag 1x1 conv
         wb_ref  : (3, W*P, W*P)      banded 3x3 weights, one band per dh
         w3_ref  : (W*P, W*Cout)      block-diag 1x1 conv
         s*_ref/b*_ref : (1, W*C)     folded BN scale / bias (f32)
         out_ref : (RB, W*Cout)
    """
    cdt = w1_ref.dtype                      # matmul operand dtype (f32 or bf16)

    x = x_ref[...].astype(jnp.float32)      # kept f32 for the residual add

    # ---- stage 1: 1x1 conv (block-diag matmul) + BN + ReLU ----
    h1 = jnp.dot(x.astype(cdt), w1_ref[...],
                 preferred_element_type=jnp.float32)
    h1 = jnp.maximum(h1 * s1_ref[...] + b1_ref[...], 0.0)     # (RB, W*P) f32

    # ---- stage 2: 3x3 conv (pad=1) ----
    # Row shifts go through the otherwise-idle MXU using host-built 0/1 shift
    # matrices (image boundaries pre-zeroed -> exact zero padding along H).
    h1c = h1.astype(cdt)
    h1_m = jnp.dot(sdn_ref[...], h1c,
                   preferred_element_type=jnp.float32).astype(cdt)
    h1_p = jnp.dot(sup_ref[...], h1c,
                   preferred_element_type=jnp.float32).astype(cdt)

    # Column taps + channel mixing are folded into banded (W*P, W*P) weights.
    acc = jnp.dot(h1_m, wb_ref[0], preferred_element_type=jnp.float32)
    acc += jnp.dot(h1c, wb_ref[1], preferred_element_type=jnp.float32)
    acc += jnp.dot(h1_p, wb_ref[2], preferred_element_type=jnp.float32)
    h2 = jnp.maximum(acc * s2_ref[...] + b2_ref[...], 0.0)    # (RB, W*P) f32

    # ---- stage 3: 1x1 conv (block-diag matmul) + BN ----
    h3 = jnp.dot(h2.astype(cdt), w3_ref[...],
                 preferred_element_type=jnp.float32)
    h3 = h3 * s3_ref[...] + b3_ref[...]

    # ---- residual add + ReLU (Cin == Cout, stride=1, no downsample) ----
    out_ref[...] = jnp.maximum(h3 + x, 0.0).astype(out_ref.dtype)


# --------------------------------------------------------------------------
# Host-side parameter preparation (done once, outside the kernel)
# --------------------------------------------------------------------------
def fold_bn(gamma, beta, mean, var, eps=1e-5):
    scale = gamma / jnp.sqrt(var + eps)
    bias = beta - mean * scale
    return scale.reshape(1, -1), bias.reshape(1, -1)


def _build_banded_w2(w2_hwio, W):
    """w2 (3,3,P,Po) HWIO -> (3, W*P, W*Po): B[dh][wp*P+i, w*Po+o] = w2[dh,dw,i,o]
    with wp = w + dw - 1 (out-of-range wp omitted == zero padding along W)."""
    _, _, P, Po = w2_hwio.shape
    bands = []
    for dh in range(3):
        B = jnp.zeros((W * P, W * Po), jnp.float32)
        for w in range(W):
            for dw in range(3):
                wp = w + dw - 1
                if 0 <= wp < W:
                    B = B.at[wp * P:(wp + 1) * P,
                             w * Po:(w + 1) * Po].set(w2_hwio[dh, dw])
        bands.append(B)
    return jnp.stack(bands, axis=0)


def _build_shift_mats(nb, H, dtype):
    """0/1 shift matrices over RB = nb*H rows; cross-image entries zeroed so
    the 3x3 conv sees zero padding at each image's top/bottom row."""
    RB = nb * H
    r = jnp.arange(RB)
    row, col = r[:, None], r[None, :]
    same_img = (row // H) == (col // H)
    s_dn = ((col == row - 1) & same_img).astype(dtype)   # (s_dn@a)[r] = a[r-1]
    s_up = ((col == row + 1) & same_img).astype(dtype)   # (s_up@a)[r] = a[r+1]
    return s_dn, s_up


def prepare_kernel_params(params, W, matmul_dtype=jnp.bfloat16):
    """Fold weights/BN into the lane-dense operands consumed by the kernel."""
    (w1, s1, b1, w2, s2, b2, w3, s3, b3) = params
    eye = jnp.eye(W, dtype=jnp.float32)
    w1_big = jnp.kron(eye, w1).astype(matmul_dtype)           # (W*Cin, W*P)
    w3_big = jnp.kron(eye, w3).astype(matmul_dtype)           # (W*P, W*Cout)
    w2_band = _build_banded_w2(w2, W).astype(matmul_dtype)    # (3, W*P, W*P)

    tile = lambda v: jnp.tile(v.reshape(1, -1), (1, W)).astype(jnp.float32)
    return (w1_big, tile(s1), tile(b1),
            w2_band, tile(s2), tile(b2),
            w3_big, tile(s3), tile(b3))


def _pick_images_per_block(N, H, target_rows=256):
    """Largest image count per grid step with ~target_rows rows, dividing N."""
    nb = max(1, min(N, target_rows // max(H, 1)))
    while N % nb != 0:
        nb -= 1
    return nb


# --------------------------------------------------------------------------
# Wrappers
# --------------------------------------------------------------------------
def bottleneck_forward_nhwc(x_nhwc, kparams, images_per_block=None):
    """Preferred entry point: NHWC in, NHWC out (stays channels-last)."""
    (w1_big, s1, b1, w2_band, s2, b2, w3_big, s3, b3) = kparams
    N, H, W, Cin = x_nhwc.shape
    WP = w2_band.shape[1]
    WCout = w3_big.shape[1]
    Cout = WCout // W
    assert Cin == Cout, "residual path requires inplanes == planes*expansion"
    assert w1_big.shape[0] == W * Cin

    nb = images_per_block or _pick_images_per_block(N, H)
    assert N % nb == 0
    RB = nb * H
    num_blocks = N // nb

    x_ld = x_nhwc.reshape(N * H, W * Cin)                    # lane-dense slab
    s_dn, s_up = _build_shift_mats(nb, H, w1_big.dtype)      # host-built, once

    out_ld = pl.pallas_call(
        bottleneck_kernel,
        out_shape=jax.ShapeDtypeStruct((N * H, WCout), x_nhwc.dtype),
        grid=(num_blocks,),
        in_specs=[
            pl.BlockSpec((RB, W * Cin), lambda i: (i, 0)),       # x slab
            pl.BlockSpec((RB, RB), lambda i: (0, 0)),            # shift h-1
            pl.BlockSpec((RB, RB), lambda i: (0, 0)),            # shift h+1
            pl.BlockSpec((W * Cin, WP), lambda i: (0, 0)),       # w1 block-diag
            pl.BlockSpec((1, WP), lambda i: (0, 0)),             # scale1
            pl.BlockSpec((1, WP), lambda i: (0, 0)),             # bias1
            pl.BlockSpec((3, WP, WP), lambda i: (0, 0, 0)),      # w2 bands
            pl.BlockSpec((1, WP), lambda i: (0, 0)),             # scale2
            pl.BlockSpec((1, WP), lambda i: (0, 0)),             # bias2
            pl.BlockSpec((WP, WCout), lambda i: (0, 0)),         # w3 block-diag
            pl.BlockSpec((1, WCout), lambda i: (0, 0)),          # scale3
            pl.BlockSpec((1, WCout), lambda i: (0, 0)),          # bias3
        ],
        out_specs=pl.BlockSpec((RB, WCout), lambda i: (i, 0)),
        compiler_params=pltpu.CompilerParams(
            dimension_semantics=("parallel",)),
    )(x_ld, s_dn, s_up, *kparams)

    return out_ld.reshape(N, H, W, Cout)


def bottleneck_forward(x_nchw, kparams, images_per_block=None):
    """NCHW wrapper for parity with the PyTorch module (transposes only here)."""
    x_nhwc = jnp.transpose(x_nchw, (0, 2, 3, 1))
    out_nhwc = bottleneck_forward_nhwc(x_nhwc, kparams, images_per_block)
    return jnp.transpose(out_nhwc, (0, 3, 1, 2))


# --------------------------------------------------------------------------
# Pure-JAX reference of the module semantics (independent of the kernel's
# lane-dense weight transforms).
# --------------------------------------------------------------------------
def reference_forward(x_nchw, params):
    (w1, s1, b1, w2, s2, b2, w3, s3, b3) = params
    x = jnp.transpose(x_nchw, (0, 2, 3, 1)).astype(jnp.float32)  # NHWC
    hp = jax.lax.Precision.HIGHEST

    h = jnp.einsum('nhwc,co->nhwo', x, w1, precision=hp)
    h = jnp.maximum(h * s1[0] + b1[0], 0.0)

    h = lax.conv_general_dilated(
        h, w2, window_strides=(1, 1), padding=((1, 1), (1, 1)),
        dimension_numbers=('NHWC', 'HWIO', 'NHWC'), precision=hp)
    h = jnp.maximum(h * s2[0] + b2[0], 0.0)

    h = jnp.einsum('nhwc,co->nhwo', h, w3, precision=hp)
    h = h * s3[0] + b3[0]

    out = jnp.maximum(h + x, 0.0)
    return jnp.transpose(out, (0, 3, 1, 2))


if __name__ == "__main__":
    # inplanes = planes * expansion so the residual add is valid without a
    # downsample branch (as in the PyTorch module with defaults).
    N, inplanes, planes, H, W = 2, 16, 4, 16, 16
    expansion = 4
    cout = planes * expansion          # == inplanes

    key = jax.random.PRNGKey(0)
    ks = jax.random.split(key, 8)

    # Conv weights (matmul / HWIO layouts; deterministic init).
    w1 = jax.random.normal(ks[0], (inplanes, planes), jnp.float32) * 0.1
    w2 = jax.random.normal(ks[1], (3, 3, planes, planes), jnp.float32) * 0.1
    w3 = jax.random.normal(ks[2], (planes, cout), jnp.float32) * 0.1

    # BatchNorm params (inference mode), folded into scale/bias.
    def bn_params(k, c):
        k1, k2, k3, k4 = jax.random.split(k, 4)
        gamma = 1.0 + 0.1 * jax.random.normal(k1, (c,), jnp.float32)
        beta = 0.1 * jax.random.normal(k2, (c,), jnp.float32)
        mean = 0.1 * jax.random.normal(k3, (c,), jnp.float32)
        var = jnp.abs(jax.random.normal(k4, (c,), jnp.float32)) + 0.5
        return fold_bn(gamma, beta, mean, var)

    s1, b1 = bn_params(ks[3], planes)
    s2, b2 = bn_params(ks[4], planes)
    s3, b3 = bn_params(ks[5], cout)
    params = (w1, s1, b1, w2, s2, b2, w3, s3, b3)

    x = jax.random.normal(ks[6], (N, inplanes, H, W), jnp.float32)  # NCHW

    ref = jax.block_until_ready(reference_forward(x, params))

    # --- exact-semantics path: f32 matmul operands -------------------------
    kp_f32 = prepare_kernel_params(params, W, matmul_dtype=jnp.float32)
    out_f32 = jax.block_until_ready(bottleneck_forward(x, kp_f32))
    assert out_f32.shape == (N, cout, H, W), out_f32.shape
    assert jnp.allclose(out_f32, ref, atol=2e-3, rtol=2e-3), (
        float(jnp.max(jnp.abs(out_f32 - ref))))

    # --- same path, one image per grid step (exercises grid>1) -------------
    out_g2 = jax.block_until_ready(bottleneck_forward(x, kp_f32,
                                                      images_per_block=1))
    assert jnp.allclose(out_g2, ref, atol=2e-3, rtol=2e-3), (
        float(jnp.max(jnp.abs(out_g2 - ref))))

    # --- fast path: bf16 matmul operands, f32 accumulate + f32 epilogues ---
    # (looser tolerance only reflects bf16 operand rounding; the kernel logic
    #  is identical to the f32 path verified above.)
    kp_bf16 = prepare_kernel_params(params, W, matmul_dtype=jnp.bfloat16)
    out_bf16 = jax.block_until_ready(bottleneck_forward(x, kp_bf16))
    assert out_bf16.shape == (N, cout, H, W), out_bf16.shape
    assert jnp.allclose(out_bf16, ref, atol=1e-1, rtol=1e-1), (
        float(jnp.max(jnp.abs(out_bf16 - ref))))

    print("KERNEL_OK")
</pallas_src>

<mosaic_0001>
module attributes {stable_mosaic.version = 11 : i64} {
  func.func @bottleneck_kernel(%arg0: i32, %arg1: memref<32x256xf32, #tpu.memory_space<vmem>>, %arg2: memref<32x32xf32, #tpu.memory_space<vmem>>, %arg3: memref<32x32xf32, #tpu.memory_space<vmem>>, %arg4: memref<256x64xf32, #tpu.memory_space<vmem>>, %arg5: memref<1x64xf32, #tpu.memory_space<vmem>>, %arg6: memref<1x64xf32, #tpu.memory_space<vmem>>, %arg7: memref<3x64x64xf32, #tpu.memory_space<vmem>>, %arg8: memref<1x64xf32, #tpu.memory_space<vmem>>, %arg9: memref<1x64xf32, #tpu.memory_space<vmem>>, %arg10: memref<64x256xf32, #tpu.memory_space<vmem>>, %arg11: memref<1x256xf32, #tpu.memory_space<vmem>>, %arg12: memref<1x256xf32, #tpu.memory_space<vmem>>, %arg13: memref<32x256xf32, #tpu.memory_space<vmem>>) attributes {dimension_semantics = [#tpu.dimension_semantics<parallel>], iteration_bounds = array<i64: 1>, scalar_prefetch = 0 : i64, scratch_operands = 0 : i64, tpu.core_type = #tpu.core_type<tc>, window_params = [{transform_indices = @transform_0, window_bounds = array<i64: 32, 256>}, {pipeline_mode = #tpu.pipeline_mode<synchronous>, transform_indices = @transform_1, window_bounds = array<i64: 32, 32>}, {pipeline_mode = #tpu.pipeline_mode<synchronous>, transform_indices = @transform_2, window_bounds = array<i64: 32, 32>}, {pipeline_mode = #tpu.pipeline_mode<synchronous>, transform_indices = @transform_3, window_bounds = array<i64: 256, 64>}, {pipeline_mode = #tpu.pipeline_mode<synchronous>, transform_indices = @transform_4, window_bounds = array<i64: 1, 64>}, {pipeline_mode = #tpu.pipeline_mode<synchronous>, transform_indices = @transform_5, window_bounds = array<i64: 1, 64>}, {pipeline_mode = #tpu.pipeline_mode<synchronous>, transform_indices = @transform_6, window_bounds = array<i64: 3, 64, 64>}, {pipeline_mode = #tpu.pipeline_mode<synchronous>, transform_indices = @transform_7, window_bounds = array<i64: 1, 64>}, {pipeline_mode = #tpu.pipeline_mode<synchronous>, transform_indices = @transform_8, window_bounds = array<i64: 1, 64>}, {pipeline_mode = #tpu.pipeline_mode<synchronous>, transform_indices = @transform_9, window_bounds = array<i64: 64, 256>}, {pipeline_mode = #tpu.pipeline_mode<synchronous>, transform_indices = @transform_10, window_bounds = array<i64: 1, 256>}, {pipeline_mode = #tpu.pipeline_mode<synchronous>, transform_indices = @transform_11, window_bounds = array<i64: 1, 256>}, {transform_indices = @transform_12, window_bounds = array<i64: 32, 256>}]} {
    %c0 = arith.constant 0 : index
    %c0_0 = arith.constant 0 : index
    %0 = vector.load %arg1[%c0, %c0_0] : memref<32x256xf32, #tpu.memory_space<vmem>>, vector<32x256xf32>
    %c0_1 = arith.constant 0 : index
    %c0_2 = arith.constant 0 : index
    %1 = vector.load %arg4[%c0_1, %c0_2] : memref<256x64xf32, #tpu.memory_space<vmem>>, vector<256x64xf32>
    %cst = arith.constant dense<0.000000e+00> : vector<32x64xf32>
    %2 = tpu.matmul %0, %1, %cst {dimension_numbers = #tpu.dot_dimension_numbers<[1], [0], [0], [1], [0, 0, 1, 1], [], []>} : vector<32x256xf32>, vector<256x64xf32>, vector<32x64xf32> -> vector<32x64xf32>
    %c0_3 = arith.constant 0 : index
    %c0_4 = arith.constant 0 : index
    %3 = vector.load %arg5[%c0_3, %c0_4] : memref<1x64xf32, #tpu.memory_space<vmem>>, vector<1x64xf32>
    %4 = vector.broadcast %3 : vector<1x64xf32> to vector<32x64xf32>
    %5 = arith.mulf %2, %4 : vector<32x64xf32>
    %c0_5 = arith.constant 0 : index
    %c0_6 = arith.constant 0 : index
    %6 = vector.load %arg6[%c0_5, %c0_6] : memref<1x64xf32, #tpu.memory_space<vmem>>, vector<1x64xf32>
    %7 = vector.broadcast %6 : vector<1x64xf32> to vector<32x64xf32>
    %8 = arith.addf %5, %7 : vector<32x64xf32>
    %cst_7 = arith.constant 0.000000e+00 : f32
    %9 = vector.broadcast %cst_7 : f32 to vector<32x64xf32>
    %10 = arith.maximumf %8, %9 : vector<32x64xf32>
    %c0_8 = arith.constant 0 : index
    %c0_9 = arith.constant 0 : index
    %11 = vector.load %arg2[%c0_8, %c0_9] : memref<32x32xf32, #tpu.memory_space<vmem>>, vector<32x32xf32>
    %cst_10 = arith.constant dense<0.000000e+00> : vector<32x64xf32>
    %12 = tpu.matmul %11, %10, %cst_10 {dimension_numbers = #tpu.dot_dimension_numbers<[1], [0], [0], [1], [0, 0, 1, 1], [], []>} : vector<32x32xf32>, vector<32x64xf32>, vector<32x64xf32> -> vector<32x64xf32>
    %c0_11 = arith.constant 0 : index
    %c0_12 = arith.constant 0 : index
    %13 = vector.load %arg3[%c0_11, %c0_12] : memref<32x32xf32, #tpu.memory_space<vmem>>, vector<32x32xf32>
    %cst_13 = arith.constant dense<0.000000e+00> : vector<32x64xf32>
    %14 = tpu.matmul %13, %10, %cst_13 {dimension_numbers = #tpu.dot_dimension_numbers<[1], [0], [0], [1], [0, 0, 1, 1], [], []>} : vector<32x32xf32>, vector<32x64xf32>, vector<32x64xf32> -> vector<32x64xf32>
    %c0_14 = arith.constant 0 : index
    %c0_15 = arith.constant 0 : index
    %c0_16 = arith.constant 0 : index
    %15 = vector.load %arg7[%c0_14, %c0_15, %c0_16] : memref<3x64x64xf32, #tpu.memory_space<vmem>>, vector<1x64x64xf32>
    %16 = vector.shape_cast %15 : vector<1x64x64xf32> to vector<64x64xf32>
    %cst_17 = arith.constant dense<0.000000e+00> : vector<32x64xf32>
    %17 = tpu.matmul %12, %16, %cst_17 {dimension_numbers = #tpu.dot_dimension_numbers<[1], [0], [0], [1], [0, 0, 1, 1], [], []>} : vector<32x64xf32>, vector<64x64xf32>, vector<32x64xf32> -> vector<32x64xf32>
    %c1 = arith.constant 1 : index
    %c0_18 = arith.constant 0 : index
    %c0_19 = arith.constant 0 : index
    %18 = vector.load %arg7[%c1, %c0_18, %c0_19] : memref<3x64x64xf32, #tpu.memory_space<vmem>>, vector<1x64x64xf32>
    %19 = vector.shape_cast %18 : vector<1x64x64xf32> to vector<64x64xf32>
    %cst_20 = arith.constant dense<0.000000e+00> : vector<32x64xf32>
    %20 = tpu.matmul %10, %19, %cst_20 {dimension_numbers = #tpu.dot_dimension_numbers<[1], [0], [0], [1], [0, 0, 1, 1], [], []>} : vector<32x64xf32>, vector<64x64xf32>, vector<32x64xf32> -> vector<32x64xf32>
    %21 = arith.addf %17, %20 : vector<32x64xf32>
    %c2 = arith.constant 2 : index
    %c0_21 = arith.constant 0 : index
    %c0_22 = arith.constant 0 : index
    %22 = vector.load %arg7[%c2, %c0_21, %c0_22] : memref<3x64x64xf32, #tpu.memory_space<vmem>>, vector<1x64x64xf32>
    %23 = vector.shape_cast %22 : vector<1x64x64xf32> to vector<64x64xf32>
    %cst_23 = arith.constant dense<0.000000e+00> : vector<32x64xf32>
    %24 = tpu.matmul %14, %23, %cst_23 {dimension_numbers = #tpu.dot_dimension_numbers<[1], [0], [0], [1], [0, 0, 1, 1], [], []>} : vector<32x64xf32>, vector<64x64xf32>, vector<32x64xf32> -> vector<32x64xf32>
    %25 = arith.addf %21, %24 : vector<32x64xf32>
    %c0_24 = arith.constant 0 : index
    %c0_25 = arith.constant 0 : index
    %26 = vector.load %arg8[%c0_24, %c0_25] : memref<1x64xf32, #tpu.memory_space<vmem>>, vector<1x64xf32>
    %27 = vector.broadcast %26 : vector<1x64xf32> to vector<32x64xf32>
    %28 = arith.mulf %25, %27 : vector<32x64xf32>
    %c0_26 = arith.constant 0 : index
    %c0_27 = arith.constant 0 : index
    %29 = vector.load %arg9[%c0_26, %c0_27] : memref<1x64xf32, #tpu.memory_space<vmem>>, vector<1x64xf32>
    %30 = vector.broadcast %29 : vector<1x64xf32> to vector<32x64xf32>
    %31 = arith.addf %28, %30 : vector<32x64xf32>
    %cst_28 = arith.constant 0.000000e+00 : f32
    %32 = vector.broadcast %cst_28 : f32 to vector<32x64xf32>
    %33 = arith.maximumf %31, %32 : vector<32x64xf32>
    %c0_29 = arith.constant 0 : index
    %c0_30 = arith.constant 0 : index
    %34 = vector.load %arg10[%c0_29, %c0_30] : memref<64x256xf32, #tpu.memory_space<vmem>>, vector<64x256xf32>
    %cst_31 = arith.constant dense<0.000000e+00> : vector<32x256xf32>
    %35 = tpu.matmul %33, %34, %cst_31 {dimension_numbers = #tpu.dot_dimension_numbers<[1], [0], [0], [1], [0, 0, 1, 1], [], []>} : vector<32x64xf32>, vector<64x256xf32>, vector<32x256xf32> -> vector<32x256xf32>
    %c0_32 = arith.constant 0 : index
    %c0_33 = arith.constant 0 : index
    %36 = vector.load %arg11[%c0_32, %c0_33] : memref<1x256xf32, #tpu.memory_space<vmem>>, vector<1x256xf32>
    %37 = vector.broadcast %36 : vector<1x256xf32> to vector<32x256xf32>
    %38 = arith.mulf %35, %37 : vector<32x256xf32>
    %c0_34 = arith.constant 0 : index
    %c0_35 = arith.constant 0 : index
    %39 = vector.load %arg12[%c0_34, %c0_35] : memref<1x256xf32, #tpu.memory_space<vmem>>, vector<1x256xf32>
    %40 = vector.broadcast %39 : vector<1x256xf32> to vector<32x256xf32>
    %41 = arith.addf %38, %40 : vector<32x256xf32>
    %42 = arith.addf %41, %0 : vector<32x256xf32>
    %cst_36 = arith.constant 0.000000e+00 : f32
    %43 = vector.broadcast %cst_36 : f32 to vector<32x256xf32>
    %44 = arith.maximumf %42, %43 : vector<32x256xf32>
    %c0_37 = arith.constant 0 : index
    %c0_38 = arith.constant 0 : index
    %45 = vector.load %arg13[%c0_37, %c0_38] : memref<32x256xf32, #tpu.memory_space<vmem>>, vector<32x256xf32>
    tpu.vector_store %arg13[%c0_37, %c0_38], %44 {strides = array<i32>} : memref<32x256xf32, #tpu.memory_space<vmem>>, vector<32x256xf32>,
    return
  }
  func.func @transform_0(%arg0: i32) -> (i32, i32) {
    %c0_i32 = arith.constant 0 : i32
    %c0_i32_0 = arith.constant 0 : i32
    return %arg0, %c0_i32 : i32, i32
  }
  func.func @transform_1(%arg0: i32) -> (i32, i32) {
    %c0_i32 = arith.constant 0 : i32
    %c0_i32_0 = arith.constant 0 : i32
    %c0_i32_1 = arith.constant 0 : i32
    return %c0_i32, %c0_i32_0 : i32, i32
  }
  func.func @transform_2(%arg0: i32) -> (i32, i32) {
    %c0_i32 = arith.constant 0 : i32
    %c0_i32_0 = arith.constant 0 : i32
    %c0_i32_1 = arith.constant 0 : i32
    return %c0_i32, %c0_i32_0 : i32, i32
  }
  func.func @transform_3(%arg0: i32) -> (i32, i32) {
    %c0_i32 = arith.constant 0 : i32
    %c0_i32_0 = arith.constant 0 : i32
    %c0_i32_1 = arith.constant 0 : i32
    return %c0_i32, %c0_i32_0 : i32, i32
  }
  func.func @transform_4(%arg0: i32) -> (i32, i32) {
    %c0_i32 = arith.constant 0 : i32
    %c0_i32_0 = arith.constant 0 : i32
    %c0_i32_1 = arith.constant 0 : i32
    return %c0_i32, %c0_i32_0 : i32, i32
  }
  func.func @transform_5(%arg0: i32) -> (i32, i32) {
    %c0_i32 = arith.constant 0 : i32
    %c0_i32_0 = arith.constant 0 : i32
    %c0_i32_1 = arith.constant 0 : i32
    return %c0_i32, %c0_i32_0 : i32, i32
  }
  func.func @transform_6(%arg0: i32) -> (i32, i32, i32) {
    %c0_i32 = arith.constant 0 : i32
    %c0_i32_0 = arith.constant 0 : i32
    %c0_i32_1 = arith.constant 0 : i32
    %c0_i32_2 = arith.constant 0 : i32
    return %c0_i32, %c0_i32_0, %c0_i32_1 : i32, i32, i32
  }
  func.func @transform_7(%arg0: i32) -> (i32, i32) {
    %c0_i32 = arith.constant 0 : i32
    %c0_i32_0 = arith.constant 0 : i32
    %c0_i32_1 = arith.constant 0 : i32
    return %c0_i32, %c0_i32_0 : i32, i32
  }
  func.func @transform_8(%arg0: i32) -> (i32, i32) {
    %c0_i32 = arith.constant 0 : i32
    %c0_i32_0 = arith.constant 0 : i32
    %c0_i32_1 = arith.constant 0 : i32
    return %c0_i32, %c0_i32_0 : i32, i32
  }
  func.func @transform_9(%arg0: i32) -> (i32, i32) {
    %c0_i32 = arith.constant 0 : i32
    %c0_i32_0 = arith.constant 0 : i32
    %c0_i32_1 = arith.constant 0 : i32
    return %c0_i32, %c0_i32_0 : i32, i32
  }
  func.func @transform_10(%arg0: i32) -> (i32, i32) {
    %c0_i32 = arith.constant 0 : i32
    %c0_i32_0 = arith.constant 0 : i32
    %c0_i32_1 = arith.constant 0 : i32
    return %c0_i32, %c0_i32_0 : i32, i32
  }
  func.func @transform_11(%arg0: i32) -> (i32, i32) {
    %c0_i32 = arith.constant 0 : i32
    %c0_i32_0 = arith.constant 0 : i32
    %c0_i32_1 = arith.constant 0 : i32
    return %c0_i32, %c0_i32_0 : i32, i32
  }
  func.func @transform_12(%arg0: i32) -> (i32, i32) {
    %c0_i32 = arith.constant 0 : i32
    %c0_i32_0 = arith.constant 0 : i32
    return %arg0, %c0_i32 : i32, i32
  }
}

</mosaic_0001>

<bundles_post_ra>
// kernel: tpu_custom_call.1
= control target key start
LH: loop header
LB: loop body
LE: loop exit
PB: predicated region body
PF: predicated region fallthrough
CT: control target
= control target key end

     0   :  { %17 = vsyncpa [#allocation3], 0  ;;  %s1838_s0 = inlined_call_operand.vmem [shape: f32[32,256], index: 0, kind: input, shape index: {}]   ;;  %s1839_s1 = inlined_call_operand.hbm [shape: f32[32,32], index: 1, kind: input, shape index: {}]   ;;  %s1840_s2 = inlined_call_operand.hbm [shape: f32[32,32], index: 2, kind: input, shape index: {}]   ;;  %s1841_s3 = inlined_call_operand.vmem [shape: f32[256,64], index: 3, kind: input, shape index: {}]   ;;  %s1842_s4 = inlined_call_operand.vmem [shape: f32[1,64], index: 4, kind: input, shape index: {}]   ;;  %s1843_s5 = inlined_call_operand.vmem [shape: f32[1,64], index: 5, kind: input, shape index: {}]   ;;  %s1844_s6 = inlined_call_operand.vmem [shape: f32[3,64,64], index: 6, kind: input, shape index: {}]   ;;  %s1845_s7 = inlined_call_operand.vmem [shape: f32[1,64], index: 7, kind: input, shape index: {}]   ;;  %s1846_s8 = inlined_call_operand.vmem [shape: f32[1,64], index: 8, kind: input, shape index: {}]   ;;  %s1847_s9 = inlined_call_operand.vmem [shape: f32[64,256], index: 9, kind: input, shape index: {}]   ;;  %s1848_s10 = inlined_call_operand.vmem [shape: f32[1,256], index: 10, kind: input, shape index: {}]   ;;  %s1849_s11 = inlined_call_operand.vmem [shape: f32[1,256], index: 11, kind: input, shape index: {}]   ;;  %s1850_s12 = inlined_call_operand.hbm [shape: f32[32,256], index: 12, kind: output, shape index: {}]  }
   0x1   :  { %18 = vsyncpa [#allocation6], 0 }
   0x2   :  { %19 = vsyncpa [#allocation4], 0  ;;  %s1405_s21 = smov [#allocation2]   ;;  %s1333_s25 = scalar_lea.hbm %s1839_s1, 512 }
   0x3   :  { %s27_s22 = sshll.u32 %s1405_s21, 4  ;;  %p1334_p0 = scmp.ne.s32.totalorder %s1839_s1, %s1333_s25  ;;  %s28_s22 = int_to_ptr.vmem [resolvable:$true] %s27_s22 }
   0x4   :  { %p1337_p1 = scmp.lt.u32.totalorder %s1333_s25, %s1839_s1 }
   0x6   :  { %p1339_p2 = pnand %p1337_p1, %p1334_p0 }
   0x8   :  { %1342 = shalt.err (!%p1339_p2)
}
   0x9   :  { %s1343_s30 = scalar_lea.vmem %s28_s22, 512  ;;  %p1348_p4 = scmp.lt.s32.totalorder %s28_s22, %s28_s22 }
   0xa   :  { %p1344_p3 = scmp.ne.s32.totalorder %s28_s22, %s1343_s30  ;;  %p1349_p5 = scmp.lt.s32.totalorder %s1343_s30, %s1343_s30 }
   0xc   :  { %p1350_p6 = por %p1349_p5, %p1348_p4 }
   0xe   :  { %p1351_p7 = pnand %p1350_p6, %p1344_p3 }
  0x10   :  { %1354 = shalt.err (!%p1351_p7)
}
  0x11   :  { %s1406_s13 = smov 128   ;;  %s1407_s14 = smov 8  }
  0x12   :  { %33 = dma.hbm_to_vmem [thread:$0]  %s1839_s1, 512, %s28_s22, [#allocation3], %s1406_s13, %s1406_s13, %s1407_s14  }
  0x13   :  { %s1408_s17 = smov [#allocation5]   ;;  %s1355_s21 = scalar_lea.hbm %s1840_s2, 512 }
  0x14   :  { %s39_s18 = sshll.u32 %s1408_s17, 4  ;;  %p1356_p8 = scmp.ne.s32.totalorder %s1840_s2, %s1355_s21  ;;  %s40_s18 = int_to_ptr.vmem [resolvable:$true] %s39_s18 }
  0x15   :  { %p1359_p9 = scmp.lt.u32.totalorder %s1355_s21, %s1840_s2 }
  0x17   :  { %p1361_p10 = pnand %p1359_p9, %p1356_p8 }
  0x19   :  { %1364 = shalt.err (!%p1361_p10)
}
  0x1a   :  { %s1365_s27 = scalar_lea.vmem %s40_s18, 512  ;;  %p1370_p12 = scmp.lt.s32.totalorder %s40_s18, %s40_s18 }
  0x1b   :  { %p1366_p11 = scmp.ne.s32.totalorder %s40_s18, %s1365_s27  ;;  %p1371_p13 = scmp.lt.s32.totalorder %s1365_s27, %s1365_s27 }
  0x1d   :  { %p1372_p0 = por %p1371_p13, %p1370_p12 }
  0x1f   :  { %p1373_p1 = pnand %p1372_p0, %p1366_p11 }
  0x21   :  { %1376 = shalt.err (!%p1373_p1)
}
  0x22   :  { %45 = dma.hbm_to_vmem [thread:$0]  %s1840_s2, 512, %s40_s18, [#allocation6], %s1406_s13, %s1406_s13, %s1407_s14  }
  0x23   :  { %1399 = dma.done.wait [#allocation3], 512  }
  0x24   :  { %1400 = vsyncadd [#allocation3], 4294966784 }
  0x25   :  { %1401 = dma.done.wait [#allocation6], 512  }
  0x26   :  { %1402 = vsyncadd [#allocation6], 4294966784  ;;  %v94_v0 = vld [vmem:[%s1841_s3 + $0x80] sm:$0xff]  ;;  %v95_v1 = vld [vmem:[%s1841_s3 + $0x88] sm:$0xff]  ;;  %vm225_vm0 = vcmask 261120   ;;  %vm441_vm1 = vcmask 523264  }
  0x27   :  { %v78_v2 = vld [vmem:[%s1841_s3] sm:$0xff]  ;;  %v1205_v3 = vpack.c.bf16 %v95_v1, %v94_v0  ;;  %v79_v4 = vld [vmem:[%s1841_s3 + $0x8] sm:$0xff]  ;;  %v96_v5 = vld [vmem:[%s1841_s3 + $0x90] sm:$0xff] }
  0x28   :  { %v97_v6 = vld [vmem:[%s1841_s3 + $0x98] sm:$0xff]  ;;  %v1207_v7 = vpack.c.bf16 %v79_v4, %v78_v2  ;;  %v80_v9 = vld [vmem:[%s1841_s3 + $0x10] sm:$0xff]  ;;  %v98_v11 = vld [vmem:[%s1841_s3 + $0xa0] sm:$0xff] }
  0x29   :  { %v1209_v8 = vpack.c.bf16 %v97_v6, %v96_v5  ;;  %v81_v10 = vld [vmem:[%s1841_s3 + $0x18] sm:$0xff]  ;;  %1206 = vmatprep.subr.bf16.mxu0 %v1205_v3  ;;  %v99_v12 = vld [vmem:[%s1841_s3 + $0xa8] sm:$0xff]  ;;  %v82_v15 = vld [vmem:[%s1841_s3 + $0x20] sm:$0xff] }
  0x2a   :  { %1208 = vmatpush3.bf16.msra.mxu0 %v1207_v7  ;;  %v1211_v13 = vpack.c.bf16 %v81_v10, %v80_v9  ;;  %v1213_v14 = vpack.c.bf16 %v99_v12, %v98_v11  ;;  %v83_v16 = vld [vmem:[%s1841_s3 + $0x28] sm:$0xff]  ;;  %v100_v17 = vld [vmem:[%s1841_s3 + $0xb0] sm:$0xff]  ;;  %v101_v18 = vld [vmem:[%s1841_s3 + $0xb8] sm:$0xff] }
  0x2b   :  { %1210 = vmatprep.subr.bf16.mxu0 %v1209_v8  ;;  %v1215_v19 = vpack.c.bf16 %v83_v16, %v82_v15  ;;  %v1217_v20 = vpack.c.bf16 %v101_v18, %v100_v17  ;;  %v84_v21 = vld [vmem:[%s1841_s3 + $0x30] sm:$0xff]  ;;  %v85_v22 = vld [vmem:[%s1841_s3 + $0x38] sm:$0xff]  ;;  %v102_v23 = vld [vmem:[%s1841_s3 + $0xc0] sm:$0xff] }
  0x2c   :  { %v103_v24 = vld [vmem:[%s1841_s3 + $0xc8] sm:$0xff]  ;;  %v1219_v26 = vpack.c.bf16 %v85_v22, %v84_v21  ;;  %v86_v28 = vld [vmem:[%s1841_s3 + $0x40] sm:$0xff]  ;;  %v104_v30 = vld [vmem:[%s1841_s3 + $0xd0] sm:$0xff] }
  0x2d   :  { %v1559_v25 = vld [vmem:[%s1838_s0 + $0x8] sm:$0xff]  ;;  %v1221_v27 = vpack.c.bf16 %v103_v24, %v102_v23  ;;  %v105_v31 = vld [vmem:[%s1841_s3 + $0xd8] sm:$0xff]  ;;  %v88_v34 = vld [vmem:[%s1841_s3 + $0x50] sm:$0xff] }
  0x2e   :  { %1212 = vmatpush3.bf16.msra.mxu0 %v1211_v13  ;;  %174 = vmatprep.mubr.f32.mxu0 %v1559_v25  ;;  %v87_v29 = vld [vmem:[%s1841_s3 + $0x48] sm:$0xff]  ;;  %v1225_v33 = vpack.c.bf16 %v105_v31, %v104_v30  ;;  %v89_v35 = vld [vmem:[%s1841_s3 + $0x58] sm:$0xff]  ;;  %v106_v36 = vld [vmem:[%s1841_s3 + $0xe0] sm:$0xff] }
  0x2f   :  { %1214 = vmatprep.subr.bf16.mxu0 %v1213_v14  ;;  %v1223_v32 = vpack.c.bf16 %v87_v29, %v86_v28  ;;  %v107_v37 = vld [vmem:[%s1841_s3 + $0xe8] sm:$0xff]  ;;  %v1227_v38 = vpack.c.bf16 %v89_v35, %v88_v34  ;;  %v90_v40 = vld [vmem:[%s1841_s3 + $0x60] sm:$0xff]  ;;  %v108_v42 = vld [vmem:[%s1841_s3 + $0xf0] sm:$0xff] }
  0x30   :  { %v1229_v39 = vpack.c.bf16 %v107_v37, %v106_v36  ;;  %v91_v41 = vld [vmem:[%s1841_s3 + $0x68] sm:$0xff]  ;;  %v109_v43 = vld [vmem:[%s1841_s3 + $0xf8] sm:$0xff]  ;;  %v92_v46 = vld [vmem:[%s1841_s3 + $0x70] sm:$0xff] }
  0x31   :  { %v1231_v44 = vpack.c.bf16 %v91_v41, %v90_v40  ;;  %v1233_v45 = vpack.c.bf16 %v109_v43, %v108_v42  ;;  %v93_v47 = vld [vmem:[%s1841_s3 + $0x78] sm:$0xff]  ;;  %v1607_v49 = vld [vmem:[%s1838_s0] sm:$0xff]  ;;  %v1619_v51 = vld [vmem:[%s1838_s0 + $0x10] sm:$0xff] }
  0x32   :  { %1216 = vmatpush3.bf16.msra.mxu0 %v1215_v19  ;;  %v1235_v48 = vpack.c.bf16 %v93_v47, %v92_v46  ;;  %v1612_v50 = vld [vmem:[%s1838_s0 + $0x18] sm:$0xff]  ;;  %v1624_v52 = vld [vmem:[%s1838_s0 + $0x28] sm:$0xff]  ;;  %v1631_v53 = vld [vmem:[%s1838_s0 + $0x20] sm:$0xff] }
  0x33   :  { %1218 = vmatprep.subr.bf16.mxu0 %v1217_v20  ;;  %v1636_v54 = vld [vmem:[%s1838_s0 + $0x38] sm:$0xff]  ;;  %v1643_v55 = vld [vmem:[%s1838_s0 + $0x30] sm:$0xff]  ;;  %v221_v56 = vld [vmem:[#allocation2] sm:$0xff] }
  0x34   :  { %1119 = vmatprep.mubr.msk.f32.mxu1 %vm225_vm0, %v221_v56  ;;  %v971_v59 = vld [vmem:[%s1842_s4] ss:$0 sm:$0xff]  ;;  %v222_v21 = vld [vmem:[#allocation2 + $0x8] sm:$0xff]  ;;  %v223_v22 = vld [vmem:[#allocation2 + $0x10] sm:$0xff] }
  0x35   :  { %v972_v63 = vld [vmem:[%s1843_s5] ss:$0 sm:$0xff]  ;;  %v982_v24 = vld [vmem:[%s1844_s6 + $0x48] sm:$0xff]  ;;  %v983_v29 = vld [vmem:[%s1844_s6 + $0x50] sm:$0xff] }
  0x36   :  { %1220 = vmatpush3.bf16.msra.mxu0 %v1219_v26  ;;  %v981_v23 = vld [vmem:[%s1844_s6 + $0x40] sm:$0xff]  ;;  %v224_v26 = vld [vmem:[#allocation2 + $0x18] sm:$0xff]  ;;  %v324_v31 = vld [vmem:[#allocation5 + $0x8] sm:$0xff] }
  0x37   :  { %1222 = vmatprep.subr.bf16.mxu0 %v1221_v27  ;;  %v323_v27 = vld [vmem:[#allocation5] sm:$0xff]  ;;  %v1253_v28 = vpack.c.bf16 %v982_v24, %v981_v23  ;;  %v984_v30 = vld [vmem:[%s1844_s6 + $0x58] sm:$0xff]  ;;  %v986_v35 = vld [vmem:[%s1844_s6 + $0x68] sm:$0xff] }
  0x38   :  { %v985_v34 = vld [vmem:[%s1844_s6 + $0x60] sm:$0xff]  ;;  %v326_v36 = vld [vmem:[#allocation5 + $0x18] sm:$0xff]  ;;  %v425_v42 = vld [vmem:[%s1844_s6 + $0x8] sm:$0xff] }
  0x39   :  { %v1261_v37 = vpack.c.bf16 %v986_v35, %v985_v34  ;;  %v424_v41 = vld [vmem:[%s1844_s6] sm:$0xff]  ;;  %v1003_v24 = vld [vmem:[%s1844_s6 + $0xb0] sm:$0xff]  ;;  %v785_v35 = vld [vmem:[%s1847_s9 + $0x68] sm:$0xff] }
  0x3a   :  { %1224 = vmatpush3.bf16.msra.mxu0 %v1223_v32  ;;  %v325_v32 = vld [vmem:[#allocation5 + $0x10] sm:$0xff]  ;;  %v1269_v43 = vpack.c.bf16 %v425_v42, %v424_v41  ;;  %v428_v47 = vld [vmem:[%s1844_s6 + $0x20] sm:$0xff]  ;;  %v1409_v41 = vmov 0.0  }
  0x3b   :  { %1226 = vmatprep.subr.bf16.mxu0 %v1225_v33  ;;  %v1257_v33 = vpack.c.bf16 %v984_v30, %v983_v29  ;;  %v1009_v42 = vld [vmem:[%s1845_s7] ss:$0 sm:$0xff] }
  0x3e   :  { %1228 = vmatpush3.bf16.msra.mxu0 %v1227_v38  ;;  %v987_v38 = vld [vmem:[%s1844_s6 + $0x70] sm:$0xff] }
  0x3f   :  { %1230 = vmatprep.subr.bf16.mxu0 %v1229_v39  ;;  %v988_v39 = vld [vmem:[%s1844_s6 + $0x78] sm:$0xff] }
  0x40   :  { %v1265_v40 = vpack.c.bf16 %v988_v39, %v987_v38  ;;  %v784_v38 = vld [vmem:[%s1847_s9 + $0x60] sm:$0xff]  ;;  %v786_v39 = vld [vmem:[%s1847_s9 + $0x70] sm:$0xff] }
  0x42   :  { %1232 = vmatpush3.bf16.msra.mxu0 %v1231_v44  ;;  %v426_v44 = vld [vmem:[%s1844_s6 + $0x10] sm:$0xff] }
  0x43   :  { %1234 = vmatprep.subr.bf16.mxu0 %v1233_v45  ;;  %v427_v45 = vld [vmem:[%s1844_s6 + $0x18] sm:$0xff] }
  0x44   :  { %v1273_v46 = vpack.c.bf16 %v427_v45, %v426_v44  ;;  %v1010_v44 = vld [vmem:[%s1846_s8] ss:$0 sm:$0xff] }
  0x46   :  { %1236 = vmatpush3.bf16.msra.mxu0 %v1235_v48  ;;  %v429_v48 = vld [vmem:[%s1844_s6 + $0x28] sm:$0xff] }
  0x47   :  { %v1277_v56 = vpack.c.bf16 %v429_v48, %v428_v47 }
  0x49   :  { %175 = vmatmul.mubr.f32.vlgmr.msra.gmra.mrb[0].mxu0 %v1607_v49 }
  0x4a   :  { %179 = vmatprep.mubr.f32.mxu0 %v1612_v50 }
  0x4d   :  { %180 = vmatmul.mubr.f32.gmra.mrb[2].mxu0 %v1619_v51 }
  0x4e   :  { %184 = vmatprep.mubr.f32.mxu0 %v1624_v52 }
  0x51   :  { %185 = vmatmul.mubr.f32.gmra.mrb[4].mxu0 %v1631_v53 }
  0x52   :  { %189 = vmatprep.mubr.f32.mxu0 %v1636_v54 }
  0x55   :  { %190 = vmatmul.mubr.f32.gmra.mrb[6].mxu0 %v1643_v55 }
  0x56   :  { %864 = vmatprep.mubr.f32.mxu0 %v1409_v41 }
 0x11c   :  { %v1047_v57 = vpop.f32.mrb[0].mxu0 }
 0x11d   :  { %v1048_v58 = vpop.f32.mrb[1].mxu0 }
 0x11e   :  { %v1049_v60 = vadd.f32 %v1048_v58, %v1047_v57  ;;  %v430_v57 = vld [vmem:[%s1844_s6 + $0x30] sm:$0xff]  ;;  %v431_v58 = vld [vmem:[%s1844_s6 + $0x38] sm:$0xff] }
 0x120   :  { %v202_v61 = vmul.f32 %v1049_v60, %v971_v59  ;;  %v1050_v62 = vpop.f32.mrb[2].mxu0  ;;  %v997_v60 = vld [vmem:[%s1844_s6 + $0x80] sm:$0xff] }
 0x121   :  { %v1051_v0 = vpop.f32.mrb[3].mxu0 }
 0x122   :  { %v1052_v1 = vadd.f32 %v1051_v0, %v1050_v62  ;;  %v213_v2 = vadd.f32 %v972_v63, %v202_v61  ;;  %v998_v61 = vld [vmem:[%s1844_s6 + $0x88] sm:$0xff]  ;;  %v775_v0 = vld [vmem:[%s1847_s9 + $0x18] sm:$0xff] }
 0x123   :  { %v1285_v62 = vpack.c.bf16 %v998_v61, %v997_v60 }
 0x124   :  { %v203_v3 = vmul.f32 %v1052_v1, %v971_v59  ;;  %v1053_v4 = vpop.f32.mrb[4].mxu0  ;;  %v217_v8 = vmax.f32 %v213_v2, 0.0  ;;  %v772_v1 = vld [vmem:[%s1847_s9] sm:$0xff] }
 0x125   :  { %v1054_v5 = vpop.f32.mrb[5].mxu0 }
 0x126   :  { %v1653_v6 = vadd.f32 %v972_v63, %v203_v3  ;;  %v1055_v7 = vadd.f32 %v1054_v5, %v1053_v4  ;;  %v774_v3 = vld [vmem:[%s1847_s9 + $0x10] sm:$0xff]  ;;  %v777_v4 = vld [vmem:[%s1847_s9 + $0x28] sm:$0xff]  ;;  %v779_v5 = vld [vmem:[%s1847_s9 + $0x38] sm:$0xff] }
 0x128   :  { %v218_v9 = vmax.f32 %v1653_v6, 0.0  ;;  %v204_v10 = vmul.f32 %v1055_v7, %v971_v59  ;;  %v1056_v11 = vpop.f32.mrb[6].mxu0  ;;  %v1303_v6 = vpack.c.bf16 %v774_v3, %v772_v1  ;;  %v1305_v7 = vpack.c.bf16 %v779_v5, %v777_v4 }
 0x129   :  { %v1057_v12 = vpop.f32.mrb[7].mxu0  ;;  %v891_v3 = vlaneseq }
 0x12a   :  { %v1237_v13 = vpack.c.bf16 %v218_v9, %v217_v8  ;;  %v1058_v14 = vadd.f32 %v1057_v12, %v1056_v11  ;;  %v215_v15 = vadd.f32 %v972_v63, %v204_v10  ;;  %v781_v10 = vld [vmem:[%s1847_s9 + $0x48] sm:$0xff]  ;;  %v783_v11 = vld [vmem:[%s1847_s9 + $0x58] sm:$0xff] }
 0x12b   :  { %v892_v4 = vshrl.u32 %v891_v3, 7 }
 0x12c   :  { %v205_v16 = vmul.f32 %v1058_v14, %v971_v59  ;;  %1238 = vmatprep.subr.bf16.mxu1 %v1237_v13  ;;  %v219_v18 = vmax.f32 %v215_v15, 0.0  ;;  %v1281_v59 = vpack.c.bf16 %v431_v58, %v430_v57  ;;  %v999_v14 = vld [vmem:[%s1844_s6 + $0x90] sm:$0xff]  ;;  %v1000_v15 = vld [vmem:[%s1844_s6 + $0x98] sm:$0xff] }
 0x12d   :  { %1240 = vmatpush3.bf16.msra.mxu1 %v1237_v13  ;;  %v893_v5 = vsub.s32 0, %v892_v4 }
 0x12e   :  { %v1658_v17 = vadd.f32 %v972_v63, %v205_v16  ;;  %v773_v63 = vld [vmem:[%s1847_s9 + $0x8] sm:$0xff] }
 0x12f   :  { %v1301_v2 = vpack.c.bf16 %v775_v0, %v773_v63 }
 0x130   :  { %v220_v19 = vmax.f32 %v1658_v17, 0.0 }
 0x131   :  { %1302 = vmatprep.subr.bf16.mxu0 %v1301_v2 }
 0x132   :  { %v1241_v20 = vpack.c.bf16 %v220_v19, %v219_v18  ;;  %1304 = vmatpush1.bf16.msra.mxu0 %v1303_v6  ;;  %v889_v6 = vld [vmem:[%s1848_s10] sm:$0x3]  ;;  %s1410_s10 = smov [#allocation7]  }
 0x133   :  { %1306 = vmatprep.subr.bf16.mxu0 %v1305_v7  ;;  %v897_v7 = vsub.s32 1, %v892_v4 }
 0x134   :  { %1242 = vmatprep.subr.bf16.mxu1 %v1241_v20 }
 0x135   :  { %1244 = vmatpush3.bf16.msra.mxu1 %v1241_v20 }
 0x136   :  { %1246 = vmatprep.subr.bf16.mxu1 %v1237_v13 }
 0x138   :  { %1120 = vmatmul.mubr.msk.f32.vlgmr.msra.gmra.mrb[0].mxu1 %vm225_vm0, %v222_v21 }
 0x139   :  { %1248 = vmatpush3.bf16.msra.mxu1 %v1237_v13  ;;  %1122 = vmatprep.mubr.msk.f32.mxu1 %vm225_vm0, %v223_v22  ;;  %v1309_v13 = vpack.c.bf16 %v783_v11, %v781_v10  ;;  %v898_v10 = vrot.slane %v889_v6, %v897_v7 }
 0x13a   :  { %1250 = vmatprep.subr.bf16.mxu1 %v1241_v20 }
 0x13c   :  { %1123 = vmatmul.mubr.msk.f32.gmra.mrb[2].mxu1 %vm225_vm0, %v224_v26  ;;  %v1004_v26 = vld [vmem:[%s1844_s6 + $0xb8] sm:$0xff] }
 0x13d   :  { %1252 = vmatpush3.bf16.msra.mxu1 %v1241_v20  ;;  %1133 = vmatprep.mubr.msk.f32.mxu1 %vm225_vm0, %v323_v27  ;;  %v1002_v20 = vld [vmem:[%s1844_s6 + $0xa8] sm:$0xff] }
 0x13e   :  { %1254 = vmatprep.subr.bf16.mxu1 %v1253_v28 }
 0x140   :  { %1134 = vmatmul.mubr.msk.f32.vlgmr.msra.gmra.mrb[4].mxu1 %vm225_vm0, %v324_v31 }
 0x141   :  { %1256 = vmatpush3.bf16.msra.mxu1 %v1253_v28  ;;  %1136 = vmatprep.mubr.msk.f32.mxu1 %vm225_vm0, %v325_v32  ;;  %v1297_v28 = vpack.c.bf16 %v1004_v26, %v1003_v24  ;;  %v780_v32 = vld [vmem:[%s1847_s9 + $0x40] sm:$0xff] }
 0x142   :  { %1258 = vmatprep.subr.bf16.mxu1 %v1257_v33 }
 0x144   :  { %1137 = vmatmul.mubr.msk.f32.gmra.mrb[6].mxu1 %vm225_vm0, %v326_v36  ;;  %v787_v36 = vld [vmem:[%s1847_s9 + $0x78] sm:$0xff] }
 0x145   :  { %1260 = vmatpush3.bf16.msra.mxu1 %v1257_v33  ;;  %1155 = vmatprep.mubr.msk.f32.mxu1 %vm441_vm1, %v217_v8  ;;  %v776_v8 = vld [vmem:[%s1847_s9 + $0x20] sm:$0xff]  ;;  %v782_v33 = vld [vmem:[%s1847_s9 + $0x50] sm:$0xff] }
 0x146   :  { %1262 = vmatprep.subr.bf16.mxu1 %v1261_v37  ;;  %v1311_v34 = vpack.c.bf16 %v782_v33, %v780_v32 }
 0x149   :  { %1264 = vmatpush3.bf16.msra.mxu1 %v1261_v37  ;;  %v1313_v37 = vpack.c.bf16 %v787_v36, %v785_v35 }
 0x14a   :  { %1266 = vmatprep.subr.bf16.mxu1 %v1265_v40 }
 0x14d   :  { %1268 = vmatpush3.bf16.msra.mxu1 %v1265_v40  ;;  %v1315_v40 = vpack.c.bf16 %v786_v39, %v784_v38 }
 0x14e   :  { %1270 = vmatprep.subr.bf16.mxu1 %v1269_v43 }
 0x150   :  { %1156 = vmatmul.mubr.msk.f32.vlgmr.msra.gmra.mrb[8].mxu1 %vm441_vm1, %v218_v9  ;;  %v778_v9 = vld [vmem:[%s1847_s9 + $0x30] sm:$0xff] }
 0x151   :  { %1158 = vmatprep.mubr.msk.f32.mxu1 %vm441_vm1, %v219_v18  ;;  %1272 = vmatpush3.bf16.msra.mxu1 %v1269_v43  ;;  %v1307_v12 = vpack.c.bf16 %v778_v9, %v776_v8  ;;  %v1289_v18 = vpack.c.bf16 %v1000_v15, %v999_v14  ;;  %v909_v8 = vld [vmem:[%s1849_s11] sm:$0x3]  ;;  %v894_v9 = vrot.slane %v889_v6, %v893_v5  ;;  %s958_s11 = sshll.u32 %s1410_s10, 4  ;;  %s959_s11 = int_to_ptr.vmem [resolvable:$true] %s958_s11 }
 0x152   :  { %1274 = vmatprep.subr.bf16.mxu1 %v1273_v46  ;;  %v914_v11 = vrot.slane %v909_v8, %v893_v5  ;;  %s1377_s18 = scalar_lea.vmem %s959_s11, 1024  ;;  %p1382_p3 = scmp.lt.s32.totalorder %s959_s11, %s959_s11 }
 0x153   :  { %1308 = vmatpush1.bf16.msra.mxu0 %v1307_v12  ;;  %p1378_p2 = scmp.ne.s32.totalorder %s959_s11, %s1377_s18  ;;  %p1383_p4 = scmp.lt.s32.totalorder %s1377_s18, %s1377_s18 }
 0x154   :  { %1159 = vmatmul.mubr.msk.f32.gmra.mrb[10].mxu1 %vm441_vm1, %v220_v19  ;;  %1310 = vmatprep.subr.bf16.mxu0 %v1309_v13  ;;  %v1001_v19 = vld [vmem:[%s1844_s6 + $0xa0] sm:$0xff]  ;;  %v918_v13 = vrot.slane %v909_v8, %v897_v7 }
 0x155   :  { %1276 = vmatpush3.bf16.msra.mxu1 %v1273_v46  ;;  %v1293_v23 = vpack.c.bf16 %v1002_v20, %v1001_v19  ;;  %p1384_p5 = por %p1383_p4, %p1382_p3 }
 0x156   :  { %1278 = vmatprep.subr.bf16.mxu1 %v1277_v56 }
 0x157   :  { %1312 = vmatpush1.bf16.msra.mxu0 %v1311_v34  ;;  %p1385_p6 = pnand %p1384_p5, %p1378_p2 }
 0x158   :  { %1314 = vmatprep.subr.bf16.mxu0 %v1313_v37 }
 0x159   :  { %1280 = vmatpush3.bf16.msra.mxu1 %v1277_v56 }
 0x15a   :  { %1282 = vmatprep.subr.bf16.mxu1 %v1281_v59 }
 0x15b   :  { %1316 = vmatpush1.bf16.msra.mxu0 %v1315_v40 }
 0x15d   :  { %1284 = vmatpush3.bf16.msra.mxu1 %v1281_v59 }
 0x15e   :  { %1286 = vmatprep.subr.bf16.mxu1 %v1285_v62 }
 0x20b   :  { %v1121_v16 = vpop.f32.mrb[0].mxu1 }
 0x20c   :  { %v304_v17 = vpop.f32.mrb[1].mxu1 }
 0x20d   :  { %1177 = vmatprep.mubr.msk.f32.mxu1 %vm441_vm1, %v304_v17 }
 0x20e   :  { %1178 = vmatmul.mubr.msk.f32.vlgmr.msra.gmra.mrb[8].mxu1 %vm441_vm1, %v1121_v16 }
 0x20f   :  { %1288 = vmatpush3.bf16.msra.mxu1 %v1285_v62  ;;  %v1124_v21 = vpop.f32.mrb[2].mxu1 }
 0x210   :  { %1290 = vmatprep.subr.bf16.mxu1 %v1289_v18  ;;  %v314_v22 = vpop.f32.mrb[3].mxu1 }
 0x211   :  { %1180 = vmatprep.mubr.msk.f32.mxu1 %vm441_vm1, %v314_v22 }
 0x212   :  { %1181 = vmatmul.mubr.msk.f32.gmra.mrb[10].mxu1 %vm441_vm1, %v1124_v21 }
 0x213   :  { %1292 = vmatpush3.bf16.msra.mxu1 %v1289_v18  ;;  %v1135_v27 = vpop.f32.mrb[4].mxu1 }
 0x214   :  { %1294 = vmatprep.subr.bf16.mxu1 %v1293_v23  ;;  %v405_v29 = vpop.f32.mrb[5].mxu1 }
 0x215   :  { %1199 = vmatprep.mubr.msk.f32.mxu1 %vm441_vm1, %v405_v29 }
 0x217   :  { %1296 = vmatpush3.bf16.msra.mxu1 %v1293_v23  ;;  %v1138_v30 = vpop.f32.mrb[6].mxu1 }
 0x218   :  { %1298 = vmatprep.subr.bf16.mxu1 %v1297_v28  ;;  %v415_v31 = vpop.f32.mrb[7].mxu1 }
 0x21b   :  { %1300 = vmatpush3.bf16.msra.mxu1 %v1297_v28 }
 0x21e   :  { %1200 = vmatmul.mubr.msk.f32.vlgmr.msra.gmra.mrb[8].mxu1 %vm441_vm1, %v1135_v27 }
 0x21f   :  { %1202 = vmatprep.mubr.msk.f32.mxu1 %vm441_vm1, %v415_v31 }
 0x222   :  { %1203 = vmatmul.mubr.msk.f32.gmra.mrb[10].mxu1 %vm441_vm1, %v1138_v30 }
 0x2f1   :  { %v1201_v43 = vpop.f32.mrb[8].mxu1 }
 0x2f2   :  { %v723_v45 = vpop.f32.mrb[9].mxu1  ;;  %v754_v46 = vmul.f32 %v1201_v43, %v1009_v42 }
 0x2f3   :  { %v753_v47 = vmul.f32 %v1009_v42, %v723_v45 }
 0x2f4   :  { %v765_v58 = vadd.f32 %v1010_v44, %v754_v46 }
 0x2f5   :  { %v764_v48 = vadd.f32 %v1010_v44, %v753_v47  ;;  %v1204_v56 = vpop.f32.mrb[10].mxu1 }
 0x2f6   :  { %v733_v57 = vpop.f32.mrb[11].mxu1  ;;  %v769_v61 = vmax.f32 %v765_v58, 0.0  ;;  %v756_v62 = vmul.f32 %v1204_v56, %v1009_v42 }
 0x2f7   :  { %v768_v59 = vmax.f32 %v764_v48, 0.0  ;;  %v755_v60 = vmul.f32 %v1009_v42, %v733_v57 }
 0x2f8   :  { %v767_v0 = vadd.f32 %v1010_v44, %v756_v62 }
 0x2f9   :  { %1011 = vmatmul.mubr.msk.f32.vlgmr.msra.gmra.mrb[8].mxu0 %vm441_vm1, %v768_v59  ;;  %v766_v63 = vadd.f32 %v1010_v44, %v755_v60 }
 0x2fa   :  { %870 = vmatprep.mubr.f32.mxu0 %v1409_v41  ;;  %v771_v2 = vmax.f32 %v767_v0, 0.0 }
 0x2fb   :  { %v770_v1 = vmax.f32 %v766_v63, 0.0 }
 0x2fd   :  { %1012 = vmatmul.mubr.msk.f32.gmra.mrb[10].mxu0 %vm441_vm1, %v769_v61 }
 0x2fe   :  { %876 = vmatprep.mubr.f32.mxu0 %v1409_v41 }
 0x301   :  { %1013 = vmatmul.mubr.msk.f32.gmra.mrb[12].mxu0 %vm441_vm1, %v770_v1 }
 0x302   :  { %882 = vmatprep.mubr.f32.mxu0 %v1409_v41 }
 0x305   :  { %1014 = vmatmul.mubr.msk.f32.gmra.mrb[14].mxu0 %vm441_vm1, %v771_v2 }
 0x3cc   :  { %v866_v12 = vpop.f32.mrb[8].mxu0 }
 0x3cd   :  { %v901_v14 = vmul.f32 %v894_v9, %v866_v12  ;;  %v868_v15 = vpop.f32.mrb[9].mxu0 }
 0x3ce   :  { %v902_v16 = vmul.f32 %v898_v10, %v868_v15 }
 0x3cf   :  { %v921_v17 = vadd.f32 %v914_v11, %v901_v14 }
 0x3d0   :  { %v922_v18 = vadd.f32 %v918_v13, %v902_v16  ;;  %v872_v19 = vpop.f32.mrb[10].mxu0 }
 0x3d1   :  { %v929_v20 = vadd.f32 %v921_v17, %v1607_v49  ;;  %v903_v21 = vmul.f32 %v894_v9, %v872_v19  ;;  %v874_v22 = vpop.f32.mrb[11].mxu0 }
 0x3d2   :  { %v930_v23 = vadd.f32 %v922_v18, %v1559_v25  ;;  %v904_v24 = vmul.f32 %v898_v10, %v874_v22 }
 0x3d3   :  { %v937_v26 = vmax.f32 %v929_v20, 0.0  ;;  %v923_v27 = vadd.f32 %v914_v11, %v903_v21 }
 0x3d4   :  { %v938_v28 = vmax.f32 %v930_v23, 0.0  ;;  %v924_v29 = vadd.f32 %v918_v13, %v904_v24  ;;  %v878_v30 = vpop.f32.mrb[12].mxu0 }
 0x3d5   :  { %945 = vst [vmem:[#allocation7] sm:$0xff] %v937_v26  ;;  %v931_v31 = vadd.f32 %v923_v27, %v1619_v51  ;;  %v905_v32 = vmul.f32 %v894_v9, %v878_v30  ;;  %v880_v33 = vpop.f32.mrb[13].mxu0 }
 0x3d6   :  { %946 = vst [vmem:[#allocation7 + $0x8] sm:$0xff] %v938_v28  ;;  %v932_v34 = vadd.f32 %v924_v29, %v1612_v50  ;;  %v906_v35 = vmul.f32 %v898_v10, %v880_v33 }
 0x3d7   :  { %v939_v49 = vmax.f32 %v931_v31, 0.0  ;;  %v925_v36 = vadd.f32 %v914_v11, %v905_v32 }
 0x3d8   :  { %v940_v37 = vmax.f32 %v932_v34, 0.0  ;;  %v926_v38 = vadd.f32 %v918_v13, %v906_v35  ;;  %v884_v25 = vpop.f32.mrb[14].mxu0 }
 0x3d9   :  { %947 = vst [vmem:[#allocation7 + $0x10] sm:$0xff] %v939_v49  ;;  %v933_v39 = vadd.f32 %v925_v36, %v1631_v53  ;;  %v907_v40 = vmul.f32 %v894_v9, %v884_v25  ;;  %v886_v41 = vpop.f32.mrb[15].mxu0 }
 0x3da   :  { %948 = vst [vmem:[#allocation7 + $0x18] sm:$0xff] %v940_v37  ;;  %v934_v42 = vadd.f32 %v926_v38, %v1624_v52  ;;  %v908_v51 = vmul.f32 %v898_v10, %v886_v41 }
 0x3db   :  { %v941_v43 = vmax.f32 %v933_v39, 0.0  ;;  %v927_v44 = vadd.f32 %v914_v11, %v907_v40 }
 0x3dc   :  { %v942_v45 = vmax.f32 %v934_v42, 0.0  ;;  %v928_v46 = vadd.f32 %v918_v13, %v908_v51 }
 0x3dd   :  { %949 = vst [vmem:[#allocation7 + $0x20] sm:$0xff] %v941_v43  ;;  %v935_v50 = vadd.f32 %v927_v44, %v1643_v55 }
 0x3de   :  { %950 = vst [vmem:[#allocation7 + $0x28] sm:$0xff] %v942_v45  ;;  %v936_v47 = vadd.f32 %v928_v46, %v1636_v54 }
 0x3df   :  { %v943_v48 = vmax.f32 %v935_v50, 0.0 }
 0x3e0   :  { %v944_v53 = vmax.f32 %v936_v47, 0.0 }
 0x3e1   :  { %951 = vst [vmem:[#allocation7 + $0x30] sm:$0xff] %v943_v48 }
 0x3e2   :  { %952 = vst [vmem:[#allocation7 + $0x38] sm:$0xff] %v944_v53 }
 0x3e3   :  { %1388 = shalt.err (!%p1385_p6)
}
 0x3e4   :  { %s1389_s24 = scalar_lea.hbm %s1850_s12, 1024 }
 0x3e5   :  { %p1390_p7 = scmp.ne.s32.totalorder %s1850_s12, %s1389_s24  ;;  %p1393_p8 = scmp.lt.u32.totalorder %s1389_s24, %s1850_s12 }
 0x3e7   :  { %p1395_p9 = pnand %p1393_p8, %p1390_p7 }
 0x3e9   :  { %1398 = shalt.err (!%p1395_p9)
}
 0x3ea   :  { %s1411_s6 = smov 256   ;;  %s1412_s22 = smov 16  }
 0x3eb   :  { %964 = dma.vmem_to_hbm [thread:$0]  %s959_s11, 1024, %s1850_s12, [#allocation4], %s1411_s6, %s1411_s6, %s1412_s22  }
 0x3ec   :  { %1403 = dma.done.wait [#allocation4], 1024  }
 0x3ed   :  { %1404 = vsyncadd [#allocation4], 4294966272 }
 0x3ee   :  { %968 = vsyncpa [#allocation3], 1 }
 0x3ef   :  { %969 = vsyncpa [#allocation6], 1 }
 0x3f0   :  { %970 = vsyncpa [#allocation4], 1 }

</bundles_post_ra>
